<compile_context>
chip_gen: v5e
topology: v5e:2x2
jax: 0.10.0
libtpu: 0.0.40
codegen_flags: <defaults>
</compile_context>

<pallas_src>
import math
import numpy as np
import jax
import jax.numpy as jnp
from jax.experimental import pallas as pl
from jax.experimental.pallas import tpu as pltpu

# ---- configuration (mirrors NHitsBlock.__init__, at small sizes) ----
FORECAST_SIZE = 36
BACKCAST_SIZE = FORECAST_SIZE * 2              # 72
POOL_SIZE = 2
FREQ_DOWNSAMPLE = 4
HIDDEN_DIM = 64
N_LAYERS = 3
HIDDEN_DOWNSAMPLE = max(math.ceil(HIDDEN_DIM / FREQ_DOWNSAMPLE), 1)  # 16
LP_BACK = BACKCAST_SIZE // POOL_SIZE           # 36
LP_FORE = FORECAST_SIZE // POOL_SIZE           # 18
BATCH = 4

# fused sizes
H2 = 2 * HIDDEN_DIM                            # 128 (block-diag hidden width)
HD2 = 2 * HIDDEN_DOWNSAMPLE                    # 32
N_OUT = 2 * BACKCAST_SIZE + 2 * FORECAST_SIZE  # 216 = bc1|bc2|fc1|fc2
N_OUT_PAD = 256                                # lane-dense padded output width
TILE_B = 8                                     # batch tile (>=8 sublanes)

# bias slab layout (all offsets 128-aligned)
OFF_B1 = 0
OFF_BM = OFF_B1 + H2                           # 128
OFF_BO = OFF_BM + H2                           # 256
OFF_BH = OFF_BO + 128                          # 384 (bo region padded to 128)
BIAS_SLAB = OFF_BH + N_OUT_PAD                 # 640


def nhits_kernel(x_ref, w1_ref, wm_ref, wo_ref, wh_ref, bias_ref, out_ref):
    # --- MaxPool1d(POOL_SIZE): max over the pre-split leading axis ---
    xp = x_ref[0]
    for k in range(1, POOL_SIZE):
        xp = jnp.maximum(xp, x_ref[k])

    # static lane slices into the packed bias slab (zero-cost views)
    b1 = bias_ref[:, OFF_B1:OFF_B1 + H2]
    bm = bias_ref[:, OFF_BM:OFF_BM + H2]
    bo = bias_ref[:, OFF_BO:OFF_BO + HD2]
    bh = bias_ref[:, OFF_BH:OFF_BH + N_OUT_PAD]

    # --- fused FFN (both paths via block-diagonal weights) ---
    # PyTorch repeats the SAME middle Linear (n_layers-1) times.
    h = jnp.maximum(
        jnp.dot(xp, w1_ref[...], preferred_element_type=jnp.float32) + b1, 0.0)
    for _ in range(N_LAYERS - 1):
        h = jnp.maximum(
            jnp.dot(h, wm_ref[...], preferred_element_type=jnp.float32) + bm, 0.0)
    h = jnp.maximum(
        jnp.dot(h, wo_ref[...], preferred_element_type=jnp.float32) + bo, 0.0)

    # --- all 4 heads + both interpolations, folded into one matmul ---
    out_ref[...] = (
        jnp.dot(h, wh_ref[...], preferred_element_type=jnp.float32) + bh)


# ---------------- glue: parameters, interpolation matrix, fusion ----------------
def make_interp_matrix(in_size, out_size):
    # Matches F.interpolate(mode='linear', align_corners=False).
    scale = in_size / out_size
    j = np.arange(out_size)
    src = np.maximum(scale * (j + 0.5) - 0.5, 0.0)
    i0 = np.minimum(np.floor(src).astype(np.int64), in_size - 1)
    i1 = np.minimum(i0 + 1, in_size - 1)
    lam = src - i0
    M = np.zeros((in_size, out_size), dtype=np.float32)
    M[i0, j] += 1.0 - lam
    M[i1, j] += lam
    return jnp.asarray(M)


def init_linear(key, in_dim, out_dim):
    # Deterministic PyTorch-style init; weight returned pre-transposed (in, out).
    kw, kb = jax.random.split(key)
    bound = 1.0 / math.sqrt(in_dim)
    w = jax.random.uniform(kw, (in_dim, out_dim), jnp.float32, -bound, bound)
    b = jax.random.uniform(kb, (1, out_dim), jnp.float32, -bound, bound)
    return w, b


def fuse_params(p):
    """Fold interpolation + head selector into weights; block-diag the FFNs;
    pack biases into one lane slab.  Pure linear-algebra identities."""
    (w1a, b1a, w1m, b1m, w1o, b1o,
     w2a, b2a, w2m, b2m, w2o, b2o,
     wbc1, bbc1, wbc12, bbc12, wbc2, bbc2, wbc21, bbc21,
     wfc1, bfc1, wfc12, bfc12, wfc2, bfc2, wfc21, bfc21,
     mb, mf) = p

    def block_diag(a, b):
        m, n = a.shape
        q, r = b.shape
        out = jnp.zeros((m + q, n + r), jnp.float32)
        return out.at[:m, :n].set(a).at[m:, n:].set(b)

    W1 = block_diag(w1a, w2a)                     # (2*LP_BACK, 128)
    Wm = block_diag(w1m, w2m)                     # (128, 128)
    Wo = block_diag(w1o, w2o)                     # (128, 32)

    # interp matrices folded into head weights
    A1, A12 = wbc1 @ mb, wbc12 @ mb
    A2, A21 = wbc2 @ mb, wbc21 @ mb
    F1, F12 = wfc1 @ mf, wfc12 @ mf
    F2, F21 = wfc2 @ mf, wfc21 @ mf
    # h1/h2/hs selector folded in: hs = h1 + h2
    Wh_top = jnp.concatenate([A1 + A12, A21, F1 + F12, F21], axis=-1)   # (16, 216)
    Wh_bot = jnp.concatenate([A12, A2 + A21, F12, F2 + F21], axis=-1)   # (16, 216)
    Wh = jnp.concatenate([Wh_top, Wh_bot], axis=0)                      # (32, 216)
    Wh = jnp.pad(Wh, ((0, 0), (0, N_OUT_PAD - N_OUT)))                  # (32, 256)

    b1 = jnp.concatenate([b1a, b2a], axis=-1)                           # (1, 128)
    bm = jnp.concatenate([b1m, b2m], axis=-1)                           # (1, 128)
    bo = jnp.concatenate([b1o, b2o], axis=-1)                           # (1, 32)
    bh = jnp.concatenate([(bbc1 + bbc12) @ mb, (bbc2 + bbc21) @ mb,
                          (bfc1 + bfc12) @ mf, (bfc2 + bfc21) @ mf],
                         axis=-1)                                        # (1, 216)
    bh = jnp.pad(bh, ((0, 0), (0, N_OUT_PAD - N_OUT)))                  # (1, 256)

    bias = jnp.zeros((1, BIAS_SLAB), jnp.float32)
    bias = bias.at[:, OFF_B1:OFF_B1 + H2].set(b1)
    bias = bias.at[:, OFF_BM:OFF_BM + H2].set(bm)
    bias = bias.at[:, OFF_BO:OFF_BO + HD2].set(bo)
    bias = bias.at[:, OFF_BH:OFF_BH + N_OUT_PAD].set(bh)
    return W1, Wm, Wo, Wh, bias


def nhits_block(x1, x2, params):
    W1, Wm, Wo, Wh, bias = fuse_params(params)

    B = x1.shape[0]
    BP = ((B + TILE_B - 1) // TILE_B) * TILE_B
    # concat series along lanes, pad batch to a sublane multiple
    xcat = jnp.concatenate([x1, x2], axis=-1)                 # (B, 2*BACKCAST)
    xcat = jnp.pad(xcat, ((0, BP - B), (0, 0)))               # (BP, 144)
    # split pooling windows onto a leading axis: x_r[k, b, g] = xcat[b, g*P + k]
    x_r = jnp.transpose(xcat.reshape(BP, 2 * LP_BACK, POOL_SIZE), (2, 0, 1))

    out = pl.pallas_call(
        nhits_kernel,
        out_shape=jax.ShapeDtypeStruct((BP, N_OUT_PAD), jnp.float32),
        grid_spec=pltpu.PrefetchScalarGridSpec(
            num_scalar_prefetch=0,
            grid=(BP // TILE_B,),
            in_specs=[
                pl.BlockSpec((POOL_SIZE, TILE_B, 2 * LP_BACK),
                             lambda i: (0, i, 0)),
                pl.BlockSpec(W1.shape, lambda i: (0, 0)),
                pl.BlockSpec(Wm.shape, lambda i: (0, 0)),
                pl.BlockSpec(Wo.shape, lambda i: (0, 0)),
                pl.BlockSpec(Wh.shape, lambda i: (0, 0)),
                pl.BlockSpec(bias.shape, lambda i: (0, 0)),
            ],
            out_specs=pl.BlockSpec((TILE_B, N_OUT_PAD), lambda i: (i, 0)),
        ),
        compiler_params=pltpu.CompilerParams(
            dimension_semantics=("parallel",)),
    )(x_r, W1, Wm, Wo, Wh, bias)

    bc1 = out[:B, 0:BACKCAST_SIZE]
    bc2 = out[:B, BACKCAST_SIZE:2 * BACKCAST_SIZE]
    fc1 = out[:B, 2 * BACKCAST_SIZE:2 * BACKCAST_SIZE + FORECAST_SIZE]
    fc2 = out[:B, 2 * BACKCAST_SIZE + FORECAST_SIZE:N_OUT]
    return bc1, bc2, fc1, fc2


# ---------------- pure-JAX reference (un-fused, for a sanity check) ----------------
def reference(x1, x2, p):
    (w1a, b1a, w1m, b1m, w1o, b1o,
     w2a, b2a, w2m, b2m, w2o, b2o,
     wbc1, bbc1, wbc12, bbc12, wbc2, bbc2, wbc21, bbc21,
     wfc1, bfc1, wfc12, bfc12, wfc2, bfc2, wfc21, bfc21,
     mb, mf) = p

    def pool(x):
        return x.reshape(BATCH, LP_BACK, POOL_SIZE).max(axis=-1)

    def ffn(xp, wa, ba, wm, bm, wo, bo):
        h = jax.nn.relu(xp @ wa + ba)
        for _ in range(N_LAYERS - 1):
            h = jax.nn.relu(h @ wm + bm)
        return jax.nn.relu(h @ wo + bo)

    def interp(c, out_size):
        in_size = c.shape[-1]
        scale = in_size / out_size
        j = np.arange(out_size)
        src = np.maximum(scale * (j + 0.5) - 0.5, 0.0)
        i0 = np.minimum(np.floor(src).astype(np.int32), in_size - 1)
        i1 = np.minimum(i0 + 1, in_size - 1)
        lam = jnp.asarray(src - i0, jnp.float32)
        return c[:, i0] * (1.0 - lam) + c[:, i1] * lam

    x1p, x2p = pool(x1), pool(x2)
    h1 = ffn(x1p, w1a, b1a, w1m, b1m, w1o, b1o)
    h2 = ffn(x2p, w2a, b2a, w2m, b2m, w2o, b2o)
    hs = h1 + h2
    bc1 = interp(h1 @ wbc1 + bbc1 + hs @ wbc12 + bbc12, BACKCAST_SIZE)
    bc2 = interp(h2 @ wbc2 + bbc2 + hs @ wbc21 + bbc21, BACKCAST_SIZE)
    fc1 = interp(h1 @ wfc1 + bfc1 + hs @ wfc12 + bfc12, FORECAST_SIZE)
    fc2 = interp(h2 @ wfc2 + bfc2 + hs @ wfc21 + bfc21, FORECAST_SIZE)
    return bc1, bc2, fc1, fc2


if __name__ == "__main__":
    key = jax.random.PRNGKey(0)
    keys = jax.random.split(key, 16)

    w1a, b1a = init_linear(keys[0], LP_BACK, HIDDEN_DIM)
    w1m, b1m = init_linear(keys[1], HIDDEN_DIM, HIDDEN_DIM)
    w1o, b1o = init_linear(keys[2], HIDDEN_DIM, HIDDEN_DOWNSAMPLE)
    w2a, b2a = init_linear(keys[3], LP_BACK, HIDDEN_DIM)
    w2m, b2m = init_linear(keys[4], HIDDEN_DIM, HIDDEN_DIM)
    w2o, b2o = init_linear(keys[5], HIDDEN_DIM, HIDDEN_DOWNSAMPLE)
    wbc1, bbc1 = init_linear(keys[6], HIDDEN_DOWNSAMPLE, LP_BACK)
    wbc12, bbc12 = init_linear(keys[7], HIDDEN_DOWNSAMPLE, LP_BACK)
    wbc2, bbc2 = init_linear(keys[8], HIDDEN_DOWNSAMPLE, LP_BACK)
    wbc21, bbc21 = init_linear(keys[9], HIDDEN_DOWNSAMPLE, LP_BACK)
    wfc1, bfc1 = init_linear(keys[10], HIDDEN_DOWNSAMPLE, LP_FORE)
    wfc12, bfc12 = init_linear(keys[11], HIDDEN_DOWNSAMPLE, LP_FORE)
    wfc2, bfc2 = init_linear(keys[12], HIDDEN_DOWNSAMPLE, LP_FORE)
    wfc21, bfc21 = init_linear(keys[13], HIDDEN_DOWNSAMPLE, LP_FORE)
    mb = make_interp_matrix(LP_BACK, BACKCAST_SIZE)
    mf = make_interp_matrix(LP_FORE, FORECAST_SIZE)

    params = (w1a, b1a, w1m, b1m, w1o, b1o,
              w2a, b2a, w2m, b2m, w2o, b2o,
              wbc1, bbc1, wbc12, bbc12, wbc2, bbc2, wbc21, bbc21,
              wfc1, bfc1, wfc12, bfc12, wfc2, bfc2, wfc21, bfc21,
              mb, mf)

    x1 = jax.random.normal(keys[14], (BATCH, BACKCAST_SIZE), jnp.float32)
    x2 = jax.random.normal(keys[15], (BATCH, BACKCAST_SIZE), jnp.float32)

    outs = nhits_block(x1, x2, params)
    outs = jax.block_until_ready(outs)

    refs = reference(x1, x2, params)
    for o, r in zip(outs, refs):
        np.testing.assert_allclose(np.asarray(o), np.asarray(r),
                                   rtol=5e-2, atol=5e-2)

    print("KERNEL_OK")
</pallas_src>

<mosaic_0001>
module attributes {stable_mosaic.version = 11 : i64} {
  func.func @nhits_kernel(%arg0: i32, %arg1: memref<2x8x72xf32, #tpu.memory_space<vmem>>, %arg2: memref<72x128xf32, #tpu.memory_space<vmem>>, %arg3: memref<128x128xf32, #tpu.memory_space<vmem>>, %arg4: memref<128x32xf32, #tpu.memory_space<vmem>>, %arg5: memref<32x256xf32, #tpu.memory_space<vmem>>, %arg6: memref<1x640xf32, #tpu.memory_space<vmem>>, %arg7: memref<8x256xf32, #tpu.memory_space<vmem>>) attributes {dimension_semantics = [#tpu.dimension_semantics<parallel>], iteration_bounds = array<i64: 1>, scalar_prefetch = 0 : i64, scratch_operands = 0 : i64, tpu.core_type = #tpu.core_type<tc>, window_params = [{transform_indices = @transform_0, window_bounds = array<i64: 2, 8, 72>}, {pipeline_mode = #tpu.pipeline_mode<synchronous>, transform_indices = @transform_1, window_bounds = array<i64: 72, 128>}, {pipeline_mode = #tpu.pipeline_mode<synchronous>, transform_indices = @transform_2, window_bounds = array<i64: 128, 128>}, {pipeline_mode = #tpu.pipeline_mode<synchronous>, transform_indices = @transform_3, window_bounds = array<i64: 128, 32>}, {pipeline_mode = #tpu.pipeline_mode<synchronous>, transform_indices = @transform_4, window_bounds = array<i64: 32, 256>}, {pipeline_mode = #tpu.pipeline_mode<synchronous>, transform_indices = @transform_5, window_bounds = array<i64: 1, 640>}, {transform_indices = @transform_6, window_bounds = array<i64: 8, 256>}]} {
    %c0 = arith.constant 0 : index
    %c0_0 = arith.constant 0 : index
    %c0_1 = arith.constant 0 : index
    %0 = vector.load %arg1[%c0, %c0_0, %c0_1] : memref<2x8x72xf32, #tpu.memory_space<vmem>>, vector<1x8x72xf32>
    %1 = vector.shape_cast %0 : vector<1x8x72xf32> to vector<8x72xf32>
    %c1 = arith.constant 1 : index
    %c0_2 = arith.constant 0 : index
    %c0_3 = arith.constant 0 : index
    %2 = vector.load %arg1[%c1, %c0_2, %c0_3] : memref<2x8x72xf32, #tpu.memory_space<vmem>>, vector<1x8x72xf32>
    %3 = vector.shape_cast %2 : vector<1x8x72xf32> to vector<8x72xf32>
    %4 = arith.maximumf %1, %3 : vector<8x72xf32>
    %c0_4 = arith.constant 0 : index
    %c0_5 = arith.constant 0 : index
    %5 = vector.load %arg6[%c0_4, %c0_5] : memref<1x640xf32, #tpu.memory_space<vmem>>, vector<1x128xf32>
    %c0_6 = arith.constant 0 : index
    %c128 = arith.constant 128 : index
    %6 = vector.load %arg6[%c0_6, %c128] : memref<1x640xf32, #tpu.memory_space<vmem>>, vector<1x128xf32>
    %c0_7 = arith.constant 0 : index
    %c256 = arith.constant 256 : index
    %7 = vector.load %arg6[%c0_7, %c256] : memref<1x640xf32, #tpu.memory_space<vmem>>, vector<1x32xf32>
    %c0_8 = arith.constant 0 : index
    %c384 = arith.constant 384 : index
    %8 = vector.load %arg6[%c0_8, %c384] : memref<1x640xf32, #tpu.memory_space<vmem>>, vector<1x256xf32>
    %c0_9 = arith.constant 0 : index
    %c0_10 = arith.constant 0 : index
    %9 = vector.load %arg2[%c0_9, %c0_10] : memref<72x128xf32, #tpu.memory_space<vmem>>, vector<72x128xf32>
    %cst = arith.constant dense<0.000000e+00> : vector<8x128xf32>
    %10 = tpu.matmul %4, %9, %cst {dimension_numbers = #tpu.dot_dimension_numbers<[1], [0], [0], [1], [0, 0, 1, 1], [], []>} : vector<8x72xf32>, vector<72x128xf32>, vector<8x128xf32> -> vector<8x128xf32>
    %11 = vector.broadcast %5 : vector<1x128xf32> to vector<8x128xf32>
    %12 = arith.addf %10, %11 : vector<8x128xf32>
    %cst_11 = arith.constant 0.000000e+00 : f32
    %13 = vector.broadcast %cst_11 : f32 to vector<8x128xf32>
    %14 = arith.maximumf %12, %13 : vector<8x128xf32>
    %c0_12 = arith.constant 0 : index
    %c0_13 = arith.constant 0 : index
    %15 = vector.load %arg3[%c0_12, %c0_13] : memref<128x128xf32, #tpu.memory_space<vmem>>, vector<128x128xf32>
    %cst_14 = arith.constant dense<0.000000e+00> : vector<8x128xf32>
    %16 = tpu.matmul %14, %15, %cst_14 {dimension_numbers = #tpu.dot_dimension_numbers<[1], [0], [0], [1], [0, 0, 1, 1], [], []>} : vector<8x128xf32>, vector<128x128xf32>, vector<8x128xf32> -> vector<8x128xf32>
    %17 = vector.broadcast %6 : vector<1x128xf32> to vector<8x128xf32>
    %18 = arith.addf %16, %17 : vector<8x128xf32>
    %cst_15 = arith.constant 0.000000e+00 : f32
    %19 = vector.broadcast %cst_15 : f32 to vector<8x128xf32>
    %20 = arith.maximumf %18, %19 : vector<8x128xf32>
    %c0_16 = arith.constant 0 : index
    %c0_17 = arith.constant 0 : index
    %21 = vector.load %arg3[%c0_16, %c0_17] : memref<128x128xf32, #tpu.memory_space<vmem>>, vector<128x128xf32>
    %cst_18 = arith.constant dense<0.000000e+00> : vector<8x128xf32>
    %22 = tpu.matmul %20, %21, %cst_18 {dimension_numbers = #tpu.dot_dimension_numbers<[1], [0], [0], [1], [0, 0, 1, 1], [], []>} : vector<8x128xf32>, vector<128x128xf32>, vector<8x128xf32> -> vector<8x128xf32>
    %23 = vector.broadcast %6 : vector<1x128xf32> to vector<8x128xf32>
    %24 = arith.addf %22, %23 : vector<8x128xf32>
    %cst_19 = arith.constant 0.000000e+00 : f32
    %25 = vector.broadcast %cst_19 : f32 to vector<8x128xf32>
    %26 = arith.maximumf %24, %25 : vector<8x128xf32>
    %c0_20 = arith.constant 0 : index
    %c0_21 = arith.constant 0 : index
    %27 = vector.load %arg4[%c0_20, %c0_21] : memref<128x32xf32, #tpu.memory_space<vmem>>, vector<128x32xf32>
    %cst_22 = arith.constant dense<0.000000e+00> : vector<8x32xf32>
    %28 = tpu.matmul %26, %27, %cst_22 {dimension_numbers = #tpu.dot_dimension_numbers<[1], [0], [0], [1], [0, 0, 1, 1], [], []>} : vector<8x128xf32>, vector<128x32xf32>, vector<8x32xf32> -> vector<8x32xf32>
    %29 = vector.broadcast %7 : vector<1x32xf32> to vector<8x32xf32>
    %30 = arith.addf %28, %29 : vector<8x32xf32>
    %cst_23 = arith.constant 0.000000e+00 : f32
    %31 = vector.broadcast %cst_23 : f32 to vector<8x32xf32>
    %32 = arith.maximumf %30, %31 : vector<8x32xf32>
    %c0_24 = arith.constant 0 : index
    %c0_25 = arith.constant 0 : index
    %33 = vector.load %arg5[%c0_24, %c0_25] : memref<32x256xf32, #tpu.memory_space<vmem>>, vector<32x256xf32>
    %cst_26 = arith.constant dense<0.000000e+00> : vector<8x256xf32>
    %34 = tpu.matmul %32, %33, %cst_26 {dimension_numbers = #tpu.dot_dimension_numbers<[1], [0], [0], [1], [0, 0, 1, 1], [], []>} : vector<8x32xf32>, vector<32x256xf32>, vector<8x256xf32> -> vector<8x256xf32>
    %35 = vector.broadcast %8 : vector<1x256xf32> to vector<8x256xf32>
    %36 = arith.addf %34, %35 : vector<8x256xf32>
    %c0_27 = arith.constant 0 : index
    %c0_28 = arith.constant 0 : index
    %37 = vector.load %arg7[%c0_27, %c0_28] : memref<8x256xf32, #tpu.memory_space<vmem>>, vector<8x256xf32>
    tpu.vector_store %arg7[%c0_27, %c0_28], %36 {strides = array<i32>} : memref<8x256xf32, #tpu.memory_space<vmem>>, vector<8x256xf32>,
    return
  }
  func.func @transform_0(%arg0: i32) -> (i32, i32, i32) {
    %c0_i32 = arith.constant 0 : i32
    %c0_i32_0 = arith.constant 0 : i32
    %c0_i32_1 = arith.constant 0 : i32
    return %c0_i32, %arg0, %c0_i32_0 : i32, i32, i32
  }
  func.func @transform_1(%arg0: i32) -> (i32, i32) {
    %c0_i32 = arith.constant 0 : i32
    %c0_i32_0 = arith.constant 0 : i32
    %c0_i32_1 = arith.constant 0 : i32
    return %c0_i32, %c0_i32_0 : i32, i32
  }
  func.func @transform_2(%arg0: i32) -> (i32, i32) {
    %c0_i32 = arith.constant 0 : i32
    %c0_i32_0 = arith.constant 0 : i32
    %c0_i32_1 = arith.constant 0 : i32
    return %c0_i32, %c0_i32_0 : i32, i32
  }
  func.func @transform_3(%arg0: i32) -> (i32, i32) {
    %c0_i32 = arith.constant 0 : i32
    %c0_i32_0 = arith.constant 0 : i32
    %c0_i32_1 = arith.constant 0 : i32
    return %c0_i32, %c0_i32_0 : i32, i32
  }
  func.func @transform_4(%arg0: i32) -> (i32, i32) {
    %c0_i32 = arith.constant 0 : i32
    %c0_i32_0 = arith.constant 0 : i32
    %c0_i32_1 = arith.constant 0 : i32
    return %c0_i32, %c0_i32_0 : i32, i32
  }
  func.func @transform_5(%arg0: i32) -> (i32, i32) {
    %c0_i32 = arith.constant 0 : i32
    %c0_i32_0 = arith.constant 0 : i32
    %c0_i32_1 = arith.constant 0 : i32
    return %c0_i32, %c0_i32_0 : i32, i32
  }
  func.func @transform_6(%arg0: i32) -> (i32, i32) {
    %c0_i32 = arith.constant 0 : i32
    %c0_i32_0 = arith.constant 0 : i32
    return %arg0, %c0_i32 : i32, i32
  }
}

</mosaic_0001>

<bundles_post_ra>
// kernel: tpu_custom_call.1
= control target key start
LH: loop header
LB: loop body
LE: loop exit
PB: predicated region body
PF: predicated region fallthrough
CT: control target
= control target key end

     0   :  { %11 = vsyncpa [#allocation3], 0  ;;  %s536_s0 = inlined_call_operand.vmem [shape: f32[2,8,72], index: 0, kind: input, shape index: {}]   ;;  %s537_s1 = inlined_call_operand.hbm [shape: f32[72,128], index: 1, kind: input, shape index: {}]   ;;  %s538_s2 = inlined_call_operand.vmem [shape: f32[128,128], index: 2, kind: input, shape index: {}]   ;;  %s539_s3 = inlined_call_operand.vmem [shape: f32[128,32], index: 3, kind: input, shape index: {}]   ;;  %s540_s4 = inlined_call_operand.hbm [shape: f32[32,256], index: 4, kind: input, shape index: {}]   ;;  %s541_s5 = inlined_call_operand.vmem [shape: f32[1,640], index: 5, kind: input, shape index: {}]   ;;  %s542_s6 = inlined_call_operand.hbm [shape: f32[8,256], index: 6, kind: output, shape index: {}]  }
   0x1   :  { %12 = vsyncpa [#allocation6], 0 }
   0x2   :  { %13 = vsyncpa [#allocation4], 0  ;;  %s20_s23 = sshll.u32 %s537_s1, 4  ;;  %s371_s24 = smov [#allocation2]   ;;  %s21_s23 = int_to_ptr.hbm [resolvable:$true] %s20_s23 }
   0x3   :  { %s22_s25 = sshll.u32 %s371_s24, 4  ;;  %s37_s28 = sshll.u32 %s540_s4, 4  ;;  %s23_s25 = int_to_ptr.vmem [resolvable:$true] %s22_s25  ;;  %s38_s28 = int_to_ptr.hbm [resolvable:$true] %s37_s28 }
   0x4   :  { %s372_s29 = smov 128   ;;  %s373_s30 = smov 8  }
   0x5   :  { %28 = dma.hbm_to_vmem [thread:$0]  %s21_s23, 1152, %s23_s25, [#allocation3], %s372_s29, %s372_s29, %s373_s30  }
   0x6   :  { %s374_s7 = smov [#allocation5]   ;;  %s375_s9 = smov 256  }
   0x7   :  { %s39_s8 = sshll.u32 %s374_s7, 4  ;;  %s376_s10 = smov 16   ;;  %s40_s8 = int_to_ptr.vmem [resolvable:$true] %s39_s8 }
   0x8   :  { %45 = dma.hbm_to_vmem [thread:$0]  %s38_s28, 1024, %s40_s8, [#allocation6], %s375_s9, %s375_s9, %s376_s10  }
   0x9   :  { %365 = dma.done.wait [#allocation3], 1152  }
   0xa   :  { %366 = vsyncadd [#allocation3], 4294966144 }
   0xb   :  { %367 = dma.done.wait [#allocation6], 1024  }
   0xc   :  { %368 = vsyncadd [#allocation6], 4294966272  ;;  %v72_v0 = vld [vmem:[#allocation2 + $0x40] sm:$0xff]  ;;  %v71_v1 = vld [vmem:[#allocation2 + $0x38] sm:$0xff]  ;;  %vm76_vm0 = vcmask 588800   ;;  %vm215_vm1 = vcmask 261120  }
   0xd   :  { %87 = vmatpush.msra.mxu0 %v72_v0  ;;  %v70_v2 = vld [vmem:[#allocation2 + $0x30] sm:$0xff]  ;;  %v116_v3 = vld [vmem:[%s538_s2 + $0x78] sm:$0xff]  ;;  %v69_v4 = vld [vmem:[#allocation2 + $0x28] sm:$0xff]  ;;  %s268_s7 = sshll.u32 %s542_s6, 4  ;;  %s269_s7 = int_to_ptr.hbm [resolvable:$true] %s268_s7 }
   0xe   :  { %120 = vmatpush.msra.mxu1 %v116_v3  ;;  %v115_v5 = vld [vmem:[%s538_s2 + $0x70] sm:$0xff]  ;;  %141 = vmatpush.msra.mxu2 %v116_v3  ;;  %v114_v6 = vld [vmem:[%s538_s2 + $0x68] sm:$0xff]  ;;  %v68_v7 = vld [vmem:[#allocation2 + $0x20] sm:$0xff] }
   0xf   :  { %88 = vmatpush.msra.mxu0 %v71_v1  ;;  %v113_v8 = vld [vmem:[%s538_s2 + $0x60] sm:$0xff]  ;;  %v67_v9 = vld [vmem:[#allocation2 + $0x18] sm:$0xff]  ;;  %v66_v11 = vld [vmem:[#allocation2 + $0x10] sm:$0xff] }
  0x10   :  { %121 = vmatpush.msra.mxu1 %v115_v5  ;;  %142 = vmatpush.msra.mxu2 %v115_v5  ;;  %v112_v10 = vld [vmem:[%s538_s2 + $0x58] sm:$0xff]  ;;  %v56_v12 = vld [vmem:[%s536_s0] sm:$0xff]  ;;  %v279_v13 = vld [vmem:[%s536_s0 + $0x8] sm:$0xff]  ;;  %s377_s0 = smov [#allocation7]  }
  0x11   :  { %89 = vmatpush.msra.mxu0 %v70_v2  ;;  %v111_v14 = vld [vmem:[%s538_s2 + $0x50] sm:$0xff]  ;;  %v65_v15 = vld [vmem:[#allocation2 + $0x8] sm:$0xff]  ;;  %v64_v17 = vld [vmem:[#allocation2] sm:$0xff]  ;;  %v59_v18 = vmax.f32 %v56_v12, %v279_v13  ;;  %s266_s28 = sshll.u32 %s377_s0, 4  ;;  %s267_s28 = int_to_ptr.vmem [resolvable:$true] %s266_s28 }
  0x12   :  { %122 = vmatpush.msra.mxu1 %v114_v6  ;;  %143 = vmatpush.msra.mxu2 %v114_v6  ;;  %v110_v16 = vld [vmem:[%s538_s2 + $0x48] sm:$0xff]  ;;  %v109_v19 = vld [vmem:[%s538_s2 + $0x40] sm:$0xff]  ;;  %v108_v20 = vld [vmem:[%s538_s2 + $0x38] sm:$0xff] }
  0x13   :  { %90 = vmatpush.msra.mxu0 %v69_v4  ;;  %v107_v21 = vld [vmem:[%s538_s2 + $0x30] sm:$0xff]  ;;  %v106_v22 = vld [vmem:[%s538_s2 + $0x28] sm:$0xff]  ;;  %v105_v23 = vld [vmem:[%s538_s2 + $0x20] sm:$0xff] }
  0x14   :  { %123 = vmatpush.msra.mxu1 %v113_v8  ;;  %144 = vmatpush.msra.mxu2 %v113_v8  ;;  %v104_v24 = vld [vmem:[%s538_s2 + $0x18] sm:$0xff]  ;;  %v103_v25 = vld [vmem:[%s538_s2 + $0x10] sm:$0xff]  ;;  %v102_v26 = vld [vmem:[%s538_s2 + $0x8] sm:$0xff] }
  0x15   :  { %91 = vmatpush.msra.mxu0 %v68_v7  ;;  %v101_v27 = vld [vmem:[%s538_s2] sm:$0xff]  ;;  %v177_v32 = vld [vmem:[%s539_s3 + $0x78] sm:$0xff]  ;;  %v176_v33 = vld [vmem:[%s539_s3 + $0x70] sm:$0xff] }
  0x16   :  { %124 = vmatpush.msra.mxu1 %v112_v10  ;;  %145 = vmatpush.msra.mxu2 %v112_v10  ;;  %v290_v28 = vld [vmem:[%s541_s5] ss:$0 sm:$0xff]  ;;  %v175_v34 = vld [vmem:[%s539_s3 + $0x68] sm:$0xff]  ;;  %v173_v36 = vld [vmem:[%s539_s3 + $0x58] sm:$0xff] }
  0x17   :  { %92 = vmatpush.msra.mxu0 %v67_v9  ;;  %181 = vmatpush.msra.mxu3 %v177_v32  ;;  %v174_v35 = vld [vmem:[%s539_s3 + $0x60] sm:$0xff]  ;;  %v172_v37 = vld [vmem:[%s539_s3 + $0x50] sm:$0xff]  ;;  %v171_v38 = vld [vmem:[%s539_s3 + $0x48] sm:$0xff] }
  0x18   :  { %125 = vmatpush.msra.mxu1 %v111_v14  ;;  %146 = vmatpush.msra.mxu2 %v111_v14  ;;  %v170_v39 = vld [vmem:[%s539_s3 + $0x40] sm:$0xff]  ;;  %v169_v40 = vld [vmem:[%s539_s3 + $0x38] sm:$0xff]  ;;  %v168_v41 = vld [vmem:[%s539_s3 + $0x30] sm:$0xff] }
  0x19   :  { %93 = vmatpush.msra.mxu0 %v66_v11  ;;  %182 = vmatpush.msra.mxu3 %v176_v33  ;;  %v167_v42 = vld [vmem:[%s539_s3 + $0x28] sm:$0xff]  ;;  %v166_v43 = vld [vmem:[%s539_s3 + $0x20] sm:$0xff]  ;;  %v165_v44 = vld [vmem:[%s539_s3 + $0x18] sm:$0xff] }
  0x1a   :  { %126 = vmatpush.msra.mxu1 %v110_v16  ;;  %147 = vmatpush.msra.mxu2 %v110_v16  ;;  %v291_v45 = vld [vmem:[%s541_s5 + $0x1] ss:$0 sm:$0xff]  ;;  %v164_v49 = vld [vmem:[%s539_s3 + $0x10] sm:$0xff]  ;;  %v163_v50 = vld [vmem:[%s539_s3 + $0x8] sm:$0xff] }
  0x1b   :  { %94 = vmatpush.msra.mxu0 %v65_v15  ;;  %183 = vmatpush.msra.mxu3 %v175_v34  ;;  %v162_v51 = vld [vmem:[%s539_s3] sm:$0xff]  ;;  %v208_v52 = vld [vmem:[#allocation5 + $0x30] sm:$0xff]  ;;  %v206_v53 = vld [vmem:[#allocation5 + $0x20] sm:$0xff] }
  0x1c   :  { %127 = vmatpush.msra.mxu1 %v109_v19  ;;  %148 = vmatpush.msra.mxu2 %v109_v19  ;;  %v204_v57 = vld [vmem:[#allocation5 + $0x10] sm:$0xff]  ;;  %v202_v58 = vld [vmem:[#allocation5] sm:$0xff]  ;;  %v209_v59 = vld [vmem:[#allocation5 + $0x38] sm:$0xff] }
  0x1d   :  { %95 = vmatpush.msra.mxu0 %v64_v17  ;;  %184 = vmatpush.msra.mxu3 %v174_v35  ;;  %v207_v60 = vld [vmem:[#allocation5 + $0x28] sm:$0xff]  ;;  %v205_v61 = vld [vmem:[#allocation5 + $0x18] sm:$0xff] }
  0x1e   :  { %280 = vmatmul.msk.f32.vlgmr.msra.gmra.mxu0 %vm76_vm0, %v59_v18  ;;  %128 = vmatpush.msra.mxu1 %v108_v20  ;;  %v203_v62 = vld [vmem:[#allocation5 + $0x8] sm:$0xff]  ;;  %v292_v63 = vld [vmem:[%s541_s5 + $0x2] ss:$0 sm:$0xff]  ;;  %v63_v3 = vld [vmem:[%s541_s5 + $0x3] sm:$0x3] }
  0x1f   :  { %149 = vmatpush.msra.mxu2 %v108_v20  ;;  %185 = vmatpush.msra.mxu3 %v173_v36  ;;  %v211_v4 = vperm.slane %v63_v3, 0  ;;  %v212_v7 = vperm.slane %v63_v3, 1 }
  0x20   :  { %129 = vmatpush.msra.mxu1 %v107_v21  ;;  %231 = vmatpush.msrb.mxu0 %v208_v52 }
  0x21   :  { %150 = vmatpush.msra.mxu2 %v107_v21  ;;  %186 = vmatpush.msra.mxu3 %v172_v37 }
  0x22   :  { %130 = vmatpush.msra.mxu1 %v106_v22  ;;  %232 = vmatpush.msrb.mxu0 %v206_v53 }
  0x23   :  { %151 = vmatpush.msra.mxu2 %v106_v22  ;;  %187 = vmatpush.msra.mxu3 %v171_v38 }
  0x24   :  { %131 = vmatpush.msra.mxu1 %v105_v23  ;;  %233 = vmatpush.msrb.mxu0 %v204_v57 }
  0x25   :  { %152 = vmatpush.msra.mxu2 %v105_v23  ;;  %188 = vmatpush.msra.mxu3 %v170_v39 }
  0x26   :  { %132 = vmatpush.msra.mxu1 %v104_v24  ;;  %234 = vmatpush.msrb.mxu0 %v202_v58 }
  0x27   :  { %153 = vmatpush.msra.mxu2 %v104_v24  ;;  %189 = vmatpush.msra.mxu3 %v169_v40 }
  0x28   :  { %133 = vmatpush.msra.mxu1 %v103_v25  ;;  %251 = vmatpush.msra.mxu0 %v209_v59 }
  0x29   :  { %154 = vmatpush.msra.mxu2 %v103_v25  ;;  %190 = vmatpush.msra.mxu3 %v168_v41 }
  0x2a   :  { %134 = vmatpush.msra.mxu1 %v102_v26  ;;  %252 = vmatpush.msra.mxu0 %v207_v60 }
  0x2b   :  { %155 = vmatpush.msra.mxu2 %v102_v26  ;;  %191 = vmatpush.msra.mxu3 %v167_v42 }
  0x2c   :  { %135 = vmatpush.msra.mxu1 %v101_v27  ;;  %253 = vmatpush.msra.mxu0 %v205_v61 }
  0x2d   :  { %156 = vmatpush.msra.mxu2 %v101_v27  ;;  %192 = vmatpush.msra.mxu3 %v166_v43 }
  0x2e   :  { %254 = vmatpush.msra.mxu0 %v203_v62 }
  0x2f   :  { %193 = vmatpush.msra.mxu3 %v165_v44 }
  0x31   :  { %194 = vmatpush.msra.mxu3 %v164_v49 }
  0x33   :  { %195 = vmatpush.msra.mxu3 %v163_v50 }
  0x35   :  { %196 = vmatpush.msra.mxu3 %v162_v51 }
  0x9b   :  { %v97_v29 = vpop.f32.mrf.mxu0 }
  0x9c   :  { %v98_v30 = vadd.f32 %v290_v28, %v97_v29 }
  0x9e   :  { %v100_v31 = vmax.f32 %v98_v30, 0.0 }
  0xa0   :  { %136 = vmatmul.f32.vlgmr.msra.gmra.mxu1 %v100_v31 }
 0x11d   :  { %v137_v46 = vpop.f32.mrf.mxu1 }
 0x11e   :  { %v138_v47 = vadd.f32 %v291_v45, %v137_v46 }
 0x120   :  { %v140_v48 = vmax.f32 %v138_v47, 0.0 }
 0x122   :  { %157 = vmatmul.f32.vlgmr.msra.gmra.mxu2 %v140_v48 }
 0x1a5   :  { %v158_v54 = vpop.f32.mrf.mxu2 }
 0x1a6   :  { %v159_v55 = vadd.f32 %v291_v45, %v158_v54 }
 0x1a8   :  { %v161_v56 = vmax.f32 %v159_v55, 0.0 }
 0x1aa   :  { %197 = vmatmul.f32.vlgmr.msra.gmra.mxu3 %v161_v56 }
 0x22d   :  { %v198_v0 = vpop.f32.mrf.mxu3 }
 0x22e   :  { %v199_v1 = vadd.f32 %v292_v63, %v198_v0 }
 0x230   :  { %v201_v2 = vmax.f32 %v199_v1, 0.0 }
 0x232   :  { %281 = vmatmul.msk.f32.vlgmr.msrb.gmra.mxu0 %vm215_vm1, %v201_v2 }
 0x23a   :  { %282 = vmatmul.msk.f32.vlgmr.msra.gmra.mxu0 %vm215_vm1, %v201_v2 }
 0x2af   :  { %v236_v5 = vpop.f32.mrf.mxu0 }
 0x2b0   :  { %v237_v6 = vadd.f32 %v236_v5, %v211_v4 }
 0x2b2   :  { %259 = vst [vmem:[#allocation7] sm:$0xff] %v237_v6 }
 0x2b7   :  { %v256_v8 = vpop.f32.mrf.mxu0 }
 0x2b8   :  { %v257_v9 = vadd.f32 %v256_v8, %v212_v7 }
 0x2ba   :  { %260 = vst [vmem:[#allocation7 + $0x8] sm:$0xff] %v257_v9 }
 0x2bb   :  { %271 = dma.vmem_to_hbm [thread:$0]  %s267_s28, 256, %s269_s7, [#allocation4]  }
 0x2bc   :  { %369 = dma.done.wait [#allocation4], 256  }
 0x2bd   :  { %370 = vsyncadd [#allocation4], 4294967040 }
 0x2be   :  { %276 = vsyncpa [#allocation3], 1 }
 0x2bf   :  { %277 = vsyncpa [#allocation6], 1 }
 0x2c0   :  { %278 = vsyncpa [#allocation4], 1 }

</bundles_post_ra>
